<compile_context>
chip_gen: v7x
topology: tpu7x:2x2x1
jax: 0.10.0
libtpu: 0.0.40
codegen_flags: <defaults>
</compile_context>

<pallas_src>
import functools
import math

import jax
import jax.numpy as jnp
from jax import lax
from jax.experimental import pallas as pl
from jax.experimental.pallas import tpu as pltpu

EPS = 1e-5


def _round_up(v, m):
    return (v + m - 1) // m * m


# ---------------------------------------------------------------------------
# Fused kernel body for one (batch sample, group) grid step:
#   Conv1d(k=3, pad=1)  +  GroupNorm(1, Cout)  +  PReLU(Cout)
# The group axis is sequential ("arbitrary"); the previous group's output is
# carried across grid steps in the persistent `src_ref` VMEM scratch.
# ---------------------------------------------------------------------------
def _sdb_kernel(x_ref, w_ref, prm_ref, o_ref, src_ref, *, cout, length, n_groups):
    g = pl.program_id(1)
    two_cp, wp = src_ref.shape
    cp = two_cp // 2
    inv_n = 1.0 / float(cout * length)        # GroupNorm population per sample

    # ---- stacked conv source: rows [0, cp) = previous block's output,
    #      rows [cp, 2cp) = this group's x slice.  Full-width aligned stores.
    @pl.when(g == 0)
    def _():                                   # first block has no skip input
        src_ref[0:cp, :] = jnp.zeros((cp, wp), jnp.float32)

    src_ref[cp:two_cp, :] = x_ref[0]

    # ---- Conv1d(k=3, pad=1) = three tap matmuls accumulated in f32.
    #      Shifted taps come from pltpu.roll (XLU).  Wrapped columns land only
    #      on halo / pad columns, which are zero in every source.
    mm = w_ref.dtype
    src = src_ref[...]
    a_m1 = pltpu.roll(src, shift=1, axis=1).astype(mm)        # operand[p] = src[p-1]
    a_0 = src.astype(mm)                                      # operand[p] = src[p]
    a_p1 = pltpu.roll(src, shift=wp - 1, axis=1).astype(mm)   # operand[p] = src[p+1]

    w = w_ref[0]                                              # (3*cp, 2*cp)
    y = jnp.dot(w[0:cp], a_m1, preferred_element_type=jnp.float32)
    y = y + jnp.dot(w[cp:2 * cp], a_0, preferred_element_type=jnp.float32)
    y = y + jnp.dot(w[2 * cp:3 * cp], a_p1, preferred_element_type=jnp.float32)

    prm = prm_ref[0]                           # (cp, 4): bias, gamma, beta, alpha
    y = y + prm[:, 0:1]                        # conv bias

    # ---- validity masks (compile-time constants): exclude halo / pad columns
    #      and padded channels from the GroupNorm statistics.
    col = lax.broadcasted_iota(jnp.int32, (1, wp), 1)
    colmask = ((col >= 1) & (col <= length)).astype(jnp.float32)   # (1, wp)
    ch = lax.broadcasted_iota(jnp.int32, (cp, 1), 0)
    mask = (ch < cout).astype(jnp.float32) * colmask               # (cp, wp)

    # ---- GroupNorm(num_groups=1): centered two-pass stats, all f32.
    s1 = jnp.sum(jnp.sum(y * mask, axis=1, keepdims=True), axis=0, keepdims=True)
    mean = s1 * inv_n                                              # (1, 1)
    d = (y - mean) * mask
    s2 = jnp.sum(jnp.sum(d * d, axis=1, keepdims=True), axis=0, keepdims=True)
    inv = lax.rsqrt(s2 * inv_n + EPS)                              # (1, 1)

    yn = (y - mean) * inv
    yn = yn * prm[:, 1:2] + prm[:, 2:3]                            # gamma, beta

    # ---- PReLU; re-zero halo/pad columns so the next group's conv (and its
    #      roll wrap-around) sees exact zeros there.  Padded channels stay 0
    #      because their gamma/beta are packed as 0.
    out = jnp.where(yn > 0, yn, prm[:, 3:4] * yn) * colmask

    src_ref[0:cp, :] = out                     # skip input for group g + 1

    @pl.when(g == n_groups - 1)
    def _():
        o_ref[0] = out.astype(o_ref.dtype)


# ---------------------------------------------------------------------------
# SDB1d forward: one-time host-side layout / packing, one fused pallas_call.
# ---------------------------------------------------------------------------
def sdb1d_forward(x, params, groups, matmul_dtype=jnp.bfloat16):
    B, C, L = x.shape
    cout = C // groups
    cp = _round_up(cout, 8)              # sublane-pad per-source channels
    wpad = _round_up(L + 2, 128)         # halo column each side + lane pad to 128

    # Group-major channel split: x[:, g::groups, :] == x.reshape(B,cout,groups,L)[:, :, g, :]
    xg = jnp.transpose(x.reshape(B, cout, groups, L), (0, 2, 1, 3))  # (B, groups, cout, L)
    x_stack = jnp.pad(xg, ((0, 0), (0, 0), (0, cp - cout), (1, wpad - 1 - L)))
    x_stack = x_stack.reshape(B * groups, cp, wpad)

    # Pack per-group conv weights as three per-tap (cp, 2*cp) matrices stacked
    # along the sublane axis: columns [0, cp) act on the previous block's
    # output, columns [cp, 2cp) on the per-group x slice.  Group 0 only uses
    # the x columns (its "prev" rows in the source buffer are zeroed anyway).
    wpack = jnp.zeros((groups, 3, cp, 2 * cp), jnp.float32)
    prm = jnp.zeros((groups, cp, 4), jnp.float32)
    for g in range(groups):
        w, b, gamma, beta, alpha = params[g]
        wt = jnp.transpose(w, (2, 0, 1))                  # (3, cout, cin)
        if g == 0:
            wpack = wpack.at[g, :, :cout, cp:cp + cout].set(wt)
        else:
            wpack = wpack.at[g, :, :cout, 0:cout].set(wt[:, :, :cout])
            wpack = wpack.at[g, :, :cout, cp:cp + cout].set(wt[:, :, cout:])
        prm = prm.at[g, :cout, 0].set(b)
        prm = prm.at[g, :cout, 1].set(gamma)
        prm = prm.at[g, :cout, 2].set(beta)
        prm = prm.at[g, :cout, 3].set(alpha)
    wpack = wpack.reshape(groups, 3 * cp, 2 * cp).astype(matmul_dtype)

    kernel = functools.partial(_sdb_kernel, cout=cout, length=L, n_groups=groups)
    out = pl.pallas_call(
        kernel,
        out_shape=jax.ShapeDtypeStruct((B, cp, wpad), jnp.float32),
        grid_spec=pltpu.PrefetchScalarGridSpec(
            num_scalar_prefetch=0,
            grid=(B, groups),
            in_specs=[
                pl.BlockSpec((1, cp, wpad), lambda b, g: (b * groups + g, 0, 0)),
                pl.BlockSpec((1, 3 * cp, 2 * cp), lambda b, g: (g, 0, 0)),
                pl.BlockSpec((1, cp, 4), lambda b, g: (g, 0, 0)),
            ],
            out_specs=pl.BlockSpec((1, cp, wpad), lambda b, g: (b, 0, 0)),
            scratch_shapes=[pltpu.VMEM((2 * cp, wpad), jnp.float32)],
        ),
        compiler_params=pltpu.CompilerParams(
            dimension_semantics=("parallel", "arbitrary"),
            vmem_limit_bytes=32 * 1024 * 1024,
        ),
    )(x_stack, wpack, prm)

    # Back to PyTorch (B, Cout, L) convention.
    return out[:, :cout, 1:L + 1]


# ---------------------------------------------------------------------------
# Pure-JAX reference (for correctness check)
# ---------------------------------------------------------------------------
def ref_block(x, w, b, gamma, beta, alpha):
    y = lax.conv_general_dilated(
        x, w, window_strides=(1,), padding=((1, 1),),
        dimension_numbers=('NCH', 'OIH', 'NCH'))
    y = y + b[None, :, None]
    mean = jnp.mean(y, axis=(1, 2), keepdims=True)
    var = jnp.mean(jnp.square(y - mean), axis=(1, 2), keepdims=True)
    yn = (y - mean) / jnp.sqrt(var + EPS)
    yn = yn * gamma[None, :, None] + beta[None, :, None]
    return jnp.where(yn > 0, yn, alpha[None, :, None] * yn)


def ref_forward(x, params, groups):
    skip = x[:, ::groups, :]
    output = None
    for idx in range(groups):
        w, b, gamma, beta, alpha = params[idx]
        output = ref_block(skip, w, b, gamma, beta, alpha)
        if idx + 1 < groups:
            skip = jnp.concatenate([output, x[:, idx + 1::groups, :]], axis=1)
    return output


# ---------------------------------------------------------------------------
# Deterministic parameters (matches nn.Conv1d / GroupNorm / PReLU shapes)
# ---------------------------------------------------------------------------
def make_params(key, out_channels, groups):
    params = []
    for idx in range(groups):
        cin = out_channels * (2 if idx > 0 else 1)
        key, kw, kb = jax.random.split(key, 3)
        bound = 1.0 / math.sqrt(cin * 3)
        w = jax.random.uniform(kw, (out_channels, cin, 3), jnp.float32,
                               minval=-bound, maxval=bound)
        b = jax.random.uniform(kb, (out_channels,), jnp.float32,
                               minval=-bound, maxval=bound)
        gamma = jnp.ones((out_channels,), jnp.float32)        # GroupNorm weight
        beta = jnp.zeros((out_channels,), jnp.float32)        # GroupNorm bias
        alpha = jnp.full((out_channels,), 0.25, jnp.float32)  # PReLU default
        params.append((w, b, gamma, beta, alpha))
    return params


if __name__ == "__main__":
    # Small shapes: B=2, in_channels=16, groups=4 -> out_channels=4, L=16.
    B, in_channels, groups, L = 2, 16, 4, 16
    out_channels = in_channels // groups

    key = jax.random.PRNGKey(0)
    key, kx = jax.random.split(key)
    x = jax.random.normal(kx, (B, in_channels, L), dtype=jnp.float32)
    params = make_params(key, out_channels, groups)

    ref = jax.block_until_ready(ref_forward(x, params, groups))

    # Strict correctness check with f32 matmul operands.
    out_f32 = jax.block_until_ready(
        sdb1d_forward(x, params, groups, matmul_dtype=jnp.float32))
    assert out_f32.shape == (B, out_channels, L)
    assert jnp.allclose(out_f32, ref, atol=1e-4, rtol=1e-4), "f32 mismatch vs reference"

    # Default fast path: bf16 matmul operands (f32 accumulation / stats / epilogue).
    out_bf16 = jax.block_until_ready(sdb1d_forward(x, params, groups))
    assert out_bf16.shape == (B, out_channels, L)
    assert jnp.allclose(out_bf16, ref, atol=5e-2, rtol=5e-2), "bf16 mismatch vs reference"

    print("KERNEL_OK")
</pallas_src>

<mosaic_0001>
module attributes {stable_mosaic.version = 11 : i64} {
  func.func @_sdb_kernel(%arg0: i32, %arg1: i32, %arg2: memref<1x8x128xf32, #tpu.memory_space<vmem>>, %arg3: memref<1x24x16xf32, #tpu.memory_space<vmem>>, %arg4: memref<1x8x4xf32, #tpu.memory_space<vmem>>, %arg5: memref<1x8x128xf32, #tpu.memory_space<vmem>>, %arg6: memref<16x128xf32, #tpu.memory_space<vmem>>) attributes {dimension_semantics = [#tpu.dimension_semantics<parallel>, #tpu.dimension_semantics<arbitrary>], iteration_bounds = array<i64: 2, 4>, scalar_prefetch = 0 : i64, scratch_operands = 1 : i64, tpu.core_type = #tpu.core_type<tc>, window_params = [{transform_indices = @transform_0, window_bounds = array<i64: 1, 8, 128>}, {transform_indices = @transform_1, window_bounds = array<i64: 1, 24, 16>}, {transform_indices = @transform_2, window_bounds = array<i64: 1, 8, 4>}, {transform_indices = @transform_3, window_bounds = array<i64: 1, 8, 128>}]} {
    %c0_i32 = arith.constant 0 : i32
    %0 = arith.cmpi eq, %arg1, %c0_i32 : i32
    %1 = arith.extui %0 : i1 to i32
    %c0_i32_0 = arith.constant 0 : i32
    %2 = arith.cmpi ne, %1, %c0_i32_0 : i32
    scf.if %2 {
      %cst_26 = arith.constant 0.000000e+00 : f32
      %82 = vector.broadcast %cst_26 : f32 to vector<8x128xf32>
      %c0_27 = arith.constant 0 : index
      %c0_28 = arith.constant 0 : index
      %83 = vector.load %arg6[%c0_27, %c0_28] : memref<16x128xf32, #tpu.memory_space<vmem>>, vector<8x128xf32>
      tpu.vector_store %arg6[%c0_27, %c0_28], %82 {strides = array<i32>} : memref<16x128xf32, #tpu.memory_space<vmem>>, vector<8x128xf32>,
    } else {
    }
    %c0 = arith.constant 0 : index
    %c0_1 = arith.constant 0 : index
    %c0_2 = arith.constant 0 : index
    %3 = vector.load %arg2[%c0, %c0_1, %c0_2] : memref<1x8x128xf32, #tpu.memory_space<vmem>>, vector<1x8x128xf32>
    %4 = vector.shape_cast %3 : vector<1x8x128xf32> to vector<8x128xf32>
    %c8 = arith.constant 8 : index
    %c0_3 = arith.constant 0 : index
    %5 = vector.load %arg6[%c8, %c0_3] : memref<16x128xf32, #tpu.memory_space<vmem>>, vector<8x128xf32>
    tpu.vector_store %arg6[%c8, %c0_3], %4 {strides = array<i32>} : memref<16x128xf32, #tpu.memory_space<vmem>>, vector<8x128xf32>,
    %c0_4 = arith.constant 0 : index
    %c0_5 = arith.constant 0 : index
    %6 = vector.load %arg6[%c0_4, %c0_5] : memref<16x128xf32, #tpu.memory_space<vmem>>, vector<16x128xf32>
    %c1_i32 = arith.constant 1 : i32
    %7 = tpu.dynamic_rotate %6 by %c1_i32 dim 1 : vector<16x128xf32>, i32 -> vector<16x128xf32>
    %c127_i32 = arith.constant 127 : i32
    %8 = tpu.dynamic_rotate %6 by %c127_i32 dim 1 : vector<16x128xf32>, i32 -> vector<16x128xf32>
    %c0_6 = arith.constant 0 : index
    %c0_7 = arith.constant 0 : index
    %c0_8 = arith.constant 0 : index
    %9 = vector.load %arg3[%c0_6, %c0_7, %c0_8] : memref<1x24x16xf32, #tpu.memory_space<vmem>>, vector<1x24x16xf32>
    %10 = vector.shape_cast %9 : vector<1x24x16xf32> to vector<24x16xf32>
    %11 = vector.extract_strided_slice %10 {offsets = [0, 0], sizes = [8, 16], strides = [1, 1]} : vector<24x16xf32> to vector<8x16xf32>
    %cst = arith.constant dense<0.000000e+00> : vector<8x128xf32>
    %12 = tpu.matmul %11, %7, %cst {dimension_numbers = #tpu.dot_dimension_numbers<[1], [0], [0], [1], [0, 0, 1, 1], [], []>} : vector<8x16xf32>, vector<16x128xf32>, vector<8x128xf32> -> vector<8x128xf32>
    %13 = vector.extract_strided_slice %10 {offsets = [8, 0], sizes = [8, 16], strides = [1, 1]} : vector<24x16xf32> to vector<8x16xf32>
    %cst_9 = arith.constant dense<0.000000e+00> : vector<8x128xf32>
    %14 = tpu.matmul %13, %6, %cst_9 {dimension_numbers = #tpu.dot_dimension_numbers<[1], [0], [0], [1], [0, 0, 1, 1], [], []>} : vector<8x16xf32>, vector<16x128xf32>, vector<8x128xf32> -> vector<8x128xf32>
    %15 = arith.addf %12, %14 : vector<8x128xf32>
    %16 = vector.extract_strided_slice %10 {offsets = [16, 0], sizes = [8, 16], strides = [1, 1]} : vector<24x16xf32> to vector<8x16xf32>
    %cst_10 = arith.constant dense<0.000000e+00> : vector<8x128xf32>
    %17 = tpu.matmul %16, %8, %cst_10 {dimension_numbers = #tpu.dot_dimension_numbers<[1], [0], [0], [1], [0, 0, 1, 1], [], []>} : vector<8x16xf32>, vector<16x128xf32>, vector<8x128xf32> -> vector<8x128xf32>
    %18 = arith.addf %15, %17 : vector<8x128xf32>
    %c0_11 = arith.constant 0 : index
    %c0_12 = arith.constant 0 : index
    %c0_13 = arith.constant 0 : index
    %19 = vector.load %arg4[%c0_11, %c0_12, %c0_13] : memref<1x8x4xf32, #tpu.memory_space<vmem>>, vector<1x8x4xf32>
    %20 = vector.shape_cast %19 : vector<1x8x4xf32> to vector<8x4xf32>
    %21 = vector.extract_strided_slice %20 {offsets = [0, 0], sizes = [8, 1], strides = [1, 1]} : vector<8x4xf32> to vector<8x1xf32>
    %22 = vector.broadcast %21 : vector<8x1xf32> to vector<8x128xf32>
    %23 = arith.addf %18, %22 : vector<8x128xf32>
    %24 = tpu.iota {dimensions = array<i32: 1>} : vector<1x128xi32>
    %c1_i32_14 = arith.constant 1 : i32
    %25 = vector.broadcast %c1_i32_14 : i32 to vector<1x128xi32>
    %26 = arith.cmpi sge, %24, %25 : vector<1x128xi32>
    %c16_i32 = arith.constant 16 : i32
    %27 = vector.broadcast %c16_i32 : i32 to vector<1x128xi32>
    %28 = arith.cmpi sle, %24, %27 : vector<1x128xi32>
    %29 = arith.andi %26, %28 : vector<1x128xi1>
    %30 = arith.extui %29 : vector<1x128xi1> to vector<1x128xi32>
    %31 = arith.sitofp %30 : vector<1x128xi32> to vector<1x128xf32>
    %32 = tpu.iota {dimensions = array<i32: 0>} : vector<8x1xi32>
    %c4_i32 = arith.constant 4 : i32
    %33 = vector.broadcast %c4_i32 : i32 to vector<8x1xi32>
    %34 = arith.cmpi slt, %32, %33 : vector<8x1xi32>
    %35 = arith.extui %34 : vector<8x1xi1> to vector<8x1xi32>
    %36 = arith.sitofp %35 : vector<8x1xi32> to vector<8x1xf32>
    %37 = vector.broadcast %36 : vector<8x1xf32> to vector<8x128xf32>
    %38 = vector.broadcast %31 : vector<1x128xf32> to vector<8x128xf32>
    %39 = arith.mulf %37, %38 : vector<8x128xf32>
    %40 = arith.mulf %23, %39 : vector<8x128xf32>
    %cst_15 = arith.constant dense<0.000000e+00> : vector<8xf32>
    %41 = vector.multi_reduction <add>, %40, %cst_15 [1] : vector<8x128xf32> to vector<8xf32>
    %42 = vector.shape_cast %41 : vector<8xf32> to vector<8x1xf32>
    %cst_16 = arith.constant dense<0.000000e+00> : vector<1xf32>
    %43 = vector.multi_reduction <add>, %42, %cst_16 [0] : vector<8x1xf32> to vector<1xf32>
    %44 = vector.shape_cast %43 : vector<1xf32> to vector<1x1xf32>
    %cst_17 = arith.constant 1.562500e-02 : f32
    %45 = vector.broadcast %cst_17 : f32 to vector<1x1xf32>
    %46 = arith.mulf %44, %45 : vector<1x1xf32>
    %47 = vector.broadcast %46 : vector<1x1xf32> to vector<8x128xf32>
    %48 = arith.subf %23, %47 : vector<8x128xf32>
    %49 = arith.mulf %48, %39 : vector<8x128xf32>
    %50 = arith.mulf %49, %49 : vector<8x128xf32>
    %cst_18 = arith.constant dense<0.000000e+00> : vector<8xf32>
    %51 = vector.multi_reduction <add>, %50, %cst_18 [1] : vector<8x128xf32> to vector<8xf32>
    %52 = vector.shape_cast %51 : vector<8xf32> to vector<8x1xf32>
    %cst_19 = arith.constant dense<0.000000e+00> : vector<1xf32>
    %53 = vector.multi_reduction <add>, %52, %cst_19 [0] : vector<8x1xf32> to vector<1xf32>
    %54 = vector.shape_cast %53 : vector<1xf32> to vector<1x1xf32>
    %cst_20 = arith.constant 1.562500e-02 : f32
    %55 = vector.broadcast %cst_20 : f32 to vector<1x1xf32>
    %56 = arith.mulf %54, %55 : vector<1x1xf32>
    %cst_21 = arith.constant 9.99999974E-6 : f32
    %57 = vector.broadcast %cst_21 : f32 to vector<1x1xf32>
    %58 = arith.addf %56, %57 : vector<1x1xf32>
    %59 = math.rsqrt %58 : vector<1x1xf32>
    %60 = vector.broadcast %46 : vector<1x1xf32> to vector<8x128xf32>
    %61 = arith.subf %23, %60 : vector<8x128xf32>
    %62 = vector.broadcast %59 : vector<1x1xf32> to vector<8x128xf32>
    %63 = arith.mulf %61, %62 : vector<8x128xf32>
    %64 = vector.extract_strided_slice %20 {offsets = [0, 1], sizes = [8, 1], strides = [1, 1]} : vector<8x4xf32> to vector<8x1xf32>
    %65 = vector.broadcast %64 : vector<8x1xf32> to vector<8x128xf32>
    %66 = arith.mulf %63, %65 : vector<8x128xf32>
    %67 = vector.extract_strided_slice %20 {offsets = [0, 2], sizes = [8, 1], strides = [1, 1]} : vector<8x4xf32> to vector<8x1xf32>
    %68 = vector.broadcast %67 : vector<8x1xf32> to vector<8x128xf32>
    %69 = arith.addf %66, %68 : vector<8x128xf32>
    %cst_22 = arith.constant 0.000000e+00 : f32
    %70 = vector.broadcast %cst_22 : f32 to vector<8x128xf32>
    %71 = arith.cmpf ogt, %69, %70 : vector<8x128xf32>
    %72 = vector.extract_strided_slice %20 {offsets = [0, 3], sizes = [8, 1], strides = [1, 1]} : vector<8x4xf32> to vector<8x1xf32>
    %73 = vector.broadcast %72 : vector<8x1xf32> to vector<8x128xf32>
    %74 = arith.mulf %73, %69 : vector<8x128xf32>
    %75 = arith.select %71, %69, %74 : vector<8x128xi1>, vector<8x128xf32>
    %76 = vector.broadcast %31 : vector<1x128xf32> to vector<8x128xf32>
    %77 = arith.mulf %75, %76 : vector<8x128xf32>
    %c0_23 = arith.constant 0 : index
    %c0_24 = arith.constant 0 : index
    %78 = vector.load %arg6[%c0_23, %c0_24] : memref<16x128xf32, #tpu.memory_space<vmem>>, vector<8x128xf32>
    tpu.vector_store %arg6[%c0_23, %c0_24], %77 {strides = array<i32>} : memref<16x128xf32, #tpu.memory_space<vmem>>, vector<8x128xf32>,
    %c3_i32 = arith.constant 3 : i32
    %79 = arith.cmpi eq, %arg1, %c3_i32 : i32
    %80 = arith.extui %79 : i1 to i32
    %c0_i32_25 = arith.constant 0 : i32
    %81 = arith.cmpi ne, %80, %c0_i32_25 : i32
    scf.if %81 {
      %c0_26 = arith.constant 0 : index
      %c0_27 = arith.constant 0 : index
      %c0_28 = arith.constant 0 : index
      %82 = vector.load %arg5[%c0_26, %c0_27, %c0_28] : memref<1x8x128xf32, #tpu.memory_space<vmem>>, vector<1x8x128xf32>
      %83 = vector.shape_cast %82 : vector<1x8x128xf32> to vector<8x128xf32>
      %84 = vector.shape_cast %77 : vector<8x128xf32> to vector<1x8x128xf32>
      tpu.vector_store %arg5[%c0_26, %c0_27, %c0_28], %84 {strides = array<i32>} : memref<1x8x128xf32, #tpu.memory_space<vmem>>, vector<1x8x128xf32>,
    } else {
    }
    return
  }
  func.func @transform_0(%arg0: i32, %arg1: i32) -> (i32, i32, i32) {
    %c4_i32 = arith.constant 4 : i32
    %0 = arith.muli %arg0, %c4_i32 : i32
    %1 = arith.addi %0, %arg1 : i32
    %c0_i32 = arith.constant 0 : i32
    %c0_i32_0 = arith.constant 0 : i32
    %c0_i32_1 = arith.constant 0 : i32
    return %1, %c0_i32, %c0_i32_0 : i32, i32, i32
  }
  func.func @transform_1(%arg0: i32, %arg1: i32) -> (i32, i32, i32) {
    %c0_i32 = arith.constant 0 : i32
    %c0_i32_0 = arith.constant 0 : i32
    %c0_i32_1 = arith.constant 0 : i32
    return %arg1, %c0_i32, %c0_i32_0 : i32, i32, i32
  }
  func.func @transform_2(%arg0: i32, %arg1: i32) -> (i32, i32, i32) {
    %c0_i32 = arith.constant 0 : i32
    %c0_i32_0 = arith.constant 0 : i32
    %c0_i32_1 = arith.constant 0 : i32
    return %arg1, %c0_i32, %c0_i32_0 : i32, i32, i32
  }
  func.func @transform_3(%arg0: i32, %arg1: i32) -> (i32, i32, i32) {
    %c0_i32 = arith.constant 0 : i32
    %c0_i32_0 = arith.constant 0 : i32
    %c0_i32_1 = arith.constant 0 : i32
    return %arg0, %c0_i32, %c0_i32_0 : i32, i32, i32
  }
}

</mosaic_0001>

<bundles_post_ra>
// kernel: tpu_custom_call.1
= control target key start
LH: loop header
LB: loop body
LE: loop exit
PB: predicated region body
PF: predicated region fallthrough
CT: control target
= control target key end

     0   :  { %8 = vsyncpa [#allocation4], 0  ;;  %s1099_s0 = inlined_call_operand.vmem [shape: f32[8,8,128], index: 0, kind: input, shape index: {}]   ;;  %s1100_s1 = inlined_call_operand.vmem [shape: f32[4,24,16], index: 1, kind: input, shape index: {}]   ;;  %s1101_s2 = inlined_call_operand.vmem [shape: f32[4,8,4], index: 2, kind: input, shape index: {}]   ;;  %s1102_s3 = inlined_call_operand.hbm [shape: f32[2,8,128], index: 3, kind: output, shape index: {}]  }
   0x1   :  { %10 = vsyncpa [#allocation4 + $0x1], 0  ;;  %s935_s12 = smov 0   ;;  %s937_s13 = smov 0  }
   0x2   :  { %s939_s14 = smov 0   ;;  %s941_s15 = smov 0  }
   0x3   :  { %s943_s16 = smov 0   ;;  %s945_s17 = smov 0  }
   0x4   :  { %s947_s18 = smov 0   ;;  %s949_s19 = smov 0  }
   0x5 LB: > { %s647_s20 = sadd.s32 4294967295, %s902_s19   ;;  %s648_s21 = sadd.s32 4294967294, %s902_s19   ;;  %s902_s19 = sphi %s949_s19, %s16_s19   ;;  %s898_s18 = sphi %s947_s18, %s1118_s18   ;;  %s894_s17 = sphi %s945_s17, %s1117_s17   ;;  %s890_s16 = sphi %s943_s16, %s1116_s16   ;;  %s886_s15 = sphi %s941_s15, %s1115_s15   ;;  %s882_s14 = sphi %s939_s14, %s1114_s14   ;;  %s878_s13 = sphi %s937_s13, %s1113_s13   ;;  %s874_s12 = sphi %s935_s12, %s1112_s12  }
   0x6   : > { %s25_s22 = sadd.s32 1, %s894_s17  ;;  %s28_s23 = sadd.s32 1, %s898_s18 }
   0x7   : > { %p26_p0 = scmp.ge.s32.totalorder %s25_s22, 4  ;;  %p127_p1 = scmp.ne.s32.totalorder %s882_s14, %s878_s13 }
   0x8   : > { %p128_p2 = scmp.eq.s32.totalorder %s647_s20, 7  ;;  %p133_p4 = scmp.ne.s32.totalorder %s878_s13, %s874_s12 }
   0x9   : > { %s1120_s22 = smov (%p26_p0, %s25_s22), 0  ;;  %s1122_s23 = smov (!%p26_p0, %s28_s23), %s898_s18 }
   0xa   : > { %1105 = sst [smem:[#allocation6_spill]] %s1120_s22  ;;  %p984_p3 = por %p128_p2, %p127_p1 }
   0xb   : > { %p30_p5 = scmp.ge.s32.totalorder %s1122_s23, 2  ;;  %p134_p6 = scmp.eq.s32.totalorder %s648_s21, 7 }
   0xc   : > { %p653_p7 = scmp.ge.s32.totalorder %s902_s19, 1  ;;  %p178_p8 = scmp.lt.s32.totalorder %s902_s19, 9 }
   0xd   : > { %s1124_s23 = smov (%p30_p5, %s1122_s23), 0  ;;  %p994_p9 = por %p134_p6, %p133_p4 }
   0xe   : > { %1107 = sst [smem:[#allocation7_spill]] %s1124_s23  ;;  %p179_p10 = pnand %p653_p7, %p178_p8 }
   0xf   : > { %s114_s26 = ssub.s32 %s898_s18, %s1124_s23  ;;  %s117_s27 = sadd.s32 1, %s882_s14 }
  0x10   : > { %p115_p11 = scmp.eq.s32.totalorder %s114_s26, 0  ;;  %182 = sbr.rel (%p179_p10) target bundleno = 748 (0x2ec), region = 32 }
  0x11   : > { %s1103_s29 = sand.u32 (!%p179_p10), 1, %s878_s13   ;;  %s655_s30 = sshll.u32 (!%p179_p10), %s890_s16, 2 }
  0x12   : > { %s1002_s28 = scalar_select %p115_p11, %s882_s14, %s117_s27  }
  0x13   : > { %s1008_s4 = sshll.u32 (!%p179_p10), %s1103_s29, 3  ;;  %s213_s5 = sadd.s32 (!%p179_p10), %s886_s15, %s655_s30 }
  0x14   : > { %p214_p12 = scmp.lt.s32.totalorder (!%p179_p10), %s213_s5, 7  ;;  %p220_p13 = scmp.lt.s32.totalorder (!%p179_p10), %s886_s15, 3 }
  0x15   : > { %s211_s22 = scalar_lea.vmem (!%p179_p10), [#allocation3], %s1008_s4  ;;  %p659_p0 = scmp.ne.s32.totalorder (!%p179_p10), %s886_s15, 0 }
  0x17   : > { %s1126_s5 = smov (!%p214_p12, %s213_s5), 7  ;;  %232 = sbr.rel (%p659_p0) target bundleno = 30 (0x1e), region = 36 }
  0x18   : > { %s221_s6 = scalar_select %p220_p13, %s886_s15, 3 }
  0x19   : > { %s656_s7 = sshll.u32 %s1126_s5, 3  ;;  %v904_v0 = vmov (!%p659_p0), 0.0  }
  0x1a   : > { %s217_s10 = scalar_lea.vmem %s1099_s0, %s656_s7  ;;  %s709_s11 = smul.u32 24, %s221_s6  ;;  %233 = vst [vmem:[#allocation2] sm:$0xff] (!%p659_p0), %v904_v0 }
  0x1b   : > { %s658_s20 = sshll.u32 %s221_s6, 3 }
  0x1c   : > { %s1019_s27 = scalar_lea.vmem %s1100_s1, %s709_s11  ;;  %s228_s30 = scalar_lea.vmem %s1101_s2, %s658_s20 }
  0x1e PF: > { %v234_v1 = vld [vmem:[%s217_s10] sm:$0xff]  ;;  %v905_v4 = vmov 0.0|0.0   ;;  %vm906_vm0 = vmmov 0   ;;  %v907_v6 = vmov 0.0   ;;  %s908_s23 = smov 1   ;;  %v247_v8 = vld [vmem:[%s1019_s27 + $0x8] sm:$0xff]  ;;  %v477_v22 = vlaneseq }
  0x1f   : > { %700 = vmatprep.subr.bf16.mxu0 %v905_v4  ;;  %703 = vmatprep.subr.bf16.mxu1 %v905_v4  ;;  %v1028_v7 = vld [vmem:[%s228_s30] sm:$0xff]  ;;  %vm249_vm1 = vcmask 130048   ;;  %v909_v9 = vmov 0   ;;  %s910_s29 = smov 127   ;;  %v248_v19 = vld [vmem:[%s1019_s27 + $0x10] sm:$0xff]  ;;  %v911_v37 = vmov 2  }
  0x20   : > { %683 = vmatprep.mubr.msk.f32.mxu0 %vm906_vm0, %v907_v6  ;;  %690 = vmatprep.mubr.msk.f32.mxu1 %vm906_vm0, %v907_v6  ;;  %v246_v17 = vld [vmem:[%s1019_s27] sm:$0xff]  ;;  %v478_v23 = vand.u32 127, %v477_v22  ;;  %v485_v24 = vshrl.u32 %v477_v22, 7  ;;  %v912_v38 = vmov 1   ;;  %v913_v39 = vmov 3   ;;  %p665_p1 = scmp.ne.s32.totalorder %s886_s15, 3 }
  0x21   : > { %v236_v2 = vld [vmem:[#allocation2] sm:$0xff]  ;;  %801 = vset.pattern.permute.xlu1 %v909_v9  ;;  %802 = vset.pattern.permute.xlu0 %v912_v38 }
  0x22   : > { %v791_v3 = vpack.i.bf16 %v234_v1, %v236_v2  ;;  %v701_v5 = vpack.c.bf16 %v234_v1, %v236_v2  ;;  %473 = vperm.xlu1 %801, %v1028_v7   ;;  %vm479_vm2 = vcmp.ge.s32.totalorder %v478_v23, 1  ;;  %vm480_vm3 = vcmp.le.s32.totalorder %v478_v23, 16 }
  0x23   : > { %vm481_vm4 = vmand %vm479_vm2, %vm480_vm3  ;;  %vm486_vm5 = vcmp.lt.s32.totalorder %v485_v24, 4 }
  0x24   : > { %792 = vrot.lane.b32.xlu0 %v791_v3, %s908_s23  ;;  %702 = vmatpush3.bf16.msra.mxu0 %v701_v5  ;;  %v663_v28 = vsel %vm481_vm4, 1.0, %v907_v6  ;;  %v664_v29 = vsel %vm486_vm5, 1.0, %v907_v6 }
  0x25   : > { %706 = vmatprep.subr.bf16.mxu0 %v905_v4  ;;  %v489_v34 = vmul.f32 %v664_v29, %v663_v28 }
  0x26   : > { %803 = vset.pattern.permute.xlu1 %v911_v37 }
  0x27   : > { %684 = vmatmul.mubr.msk.f32.vlgmr.msra.gmra.mrb[0].mxu0 %vm249_vm1, %v247_v8 }
  0x28   : > { %797 = vrot.lane.b32.xlu0 %v791_v3, %s910_s29  ;;  %697 = vmatprep.mubr.msk.f32.mxu0 %vm906_vm0, %v907_v6 }
  0x96   : > { %v793_v10 = vpop.permute.xlu0 %792 }
  0x97   : > { %v795_v11 = vunpack.i.h.bf16 %v793_v10  ;;  %v794_v12 = vunpack.i.l.bf16 %v793_v10 }
  0x99   : > { %v704_v13 = vpack.c.bf16 %v795_v11, %v794_v12 }
  0x9a   : > { %v798_v14 = vpop.permute.xlu0 %797 }
  0x9b   : > { %v800_v15 = vunpack.i.h.bf16 %v798_v14  ;;  %v799_v16 = vunpack.i.l.bf16 %v798_v14  ;;  %705 = vmatpush3.bf16.msra.mxu1 %v704_v13 }
  0x9d   : > { %v707_v18 = vpack.c.bf16 %v800_v15, %v799_v16 }
  0x9e   : > { %691 = vmatmul.mubr.msk.f32.vlgmr.msra.gmra.mrb[0].mxu1 %vm249_vm1, %v246_v17 }
  0x9f   : > { %708 = vmatpush3.bf16.msra.mxu0 %v707_v18 }
  0xa1   : > { %v474_v31 = vpop.permute.xlu1 %473 }
  0xa2   : > { %698 = vmatmul.mubr.msk.f32.vlgmr.msra.gmra.mrb[2].mxu0 %vm249_vm1, %v248_v19 }
  0xfa   : > { %v319_v20 = vpop.f32.mrb[0].mxu0 }
  0xfb   : > { %v685_v21 = vpop.f32.mrb[1].mxu0 }
 0x171   : > { %v392_v25 = vpop.f32.mrb[0].mxu1 }
 0x172   : > { %v393_v26 = vadd.f32 %v392_v25, %v319_v20  ;;  %v692_v27 = vpop.f32.mrb[1].mxu1 }
 0x175   : > { %v465_v30 = vpop.f32.mrb[2].mxu0 }
 0x176   : > { %v469_v32 = vadd.f32 %v465_v30, %v393_v26  ;;  %v699_v33 = vpop.f32.mrb[3].mxu0 }
 0x178   : > { %v476_v35 = vadd.f32 %v474_v31, %v469_v32 }
 0x17a   : > { %v490_v36 = vmul.f32 %v489_v34, %v476_v35 }
 0x17c   : > { %491 = vadd.xlane.f32.xlu1 %v490_v36 }
 0x18d   : > { %521 = vperm.xlu1 %803, %v1028_v7  }
 0x191   : > { %804 = vset.pattern.permute.xlu1 %v913_v39 }
 0x192   : > { %527 = vperm.xlu1 %804, %v1028_v7  }
 0x209   : > { %v492_v40 = vpop.xlane.xlu1 %491 }
 0x20a   : > { %v493_v41 = vrot.slane %v492_v40, 4 }
 0x20c   : > { %v494_v42 = vadd.f32 %v493_v41, %v492_v40 }
 0x20d   : > { %v522_v60 = vpop.permute.xlu1 %521 }
 0x20e   : > { %v495_v43 = vrot.slane %v494_v42, 2 }
 0x210   : > { %v496_v44 = vadd.f32 %v495_v43, %v494_v42 }
 0x211   : > { %v528_v1 = vpop.permute.xlu1 %527 }
 0x212   : > { %v497_v45 = vrot.slane %v496_v44, 1 }
 0x214   : > { %v498_v46 = vadd.f32 %v497_v45, %v496_v44 }
 0x216   : > { %v499_v47 = vmul.f32 0.015625, %v498_v46 }
 0x218   : > { %v500_v48 = vsub.f32 %v476_v35, %v499_v47 }
 0x21a   : > { %v501_v49 = vmul.f32 %v500_v48, %v489_v34 }
 0x21c   : > { %v502_v50 = vmul.f32 %v501_v49, %v501_v49 }
 0x21e   : > { %503 = vadd.xlane.f32.xlu0 %v502_v50 }
 0x234   : > { %516 = vperm.xlu0 %802, %v1028_v7  }
 0x238   : > { %805 = vset.pattern.permute.xlu0 %v913_v39 }
 0x2ab   : > { %v504_v51 = vpop.xlane.xlu0 %503 }
 0x2ac   : > { %v505_v52 = vrot.slane %v504_v51, 4 }
 0x2ae   : > { %v506_v53 = vadd.f32 %v505_v52, %v504_v51 }
 0x2b0   : > { %v507_v54 = vrot.slane %v506_v53, 2 }
 0x2b2   : > { %v508_v55 = vadd.f32 %v507_v54, %v506_v53 }
 0x2b3   : > { %v517_v62 = vpop.permute.xlu0 %516 }
 0x2b4   : > { %v509_v56 = vrot.slane %v508_v55, 1 }
 0x2b6   : > { %v510_v57 = vadd.f32 %v509_v56, %v508_v55 }
 0x2b8   : > { %v511_v58 = vmul.f32 0.015625, %v510_v57 }
 0x2ba   : > { %v512_v59 = vadd.f32 1e-05, %v511_v58 }
 0x2bc   : > { %806 = vrsqrt.f32 %v512_v59 }
 0x2c6   : > { %v807_v61 = vpop.eup %806 }
 0x2c7   : > { %v514_v63 = vmul.f32 %v807_v61, %v500_v48 }
 0x2c9   : > { %v519_v0 = vmul.f32 %v517_v62, %v514_v63 }
 0x2cb   : > { %v524_v2 = vadd.f32 %v522_v60, %v519_v0 }
 0x2cc   : > { %537 = sbr.rel (%p665_p1) target bundleno = 723 (0x2d3), region = 40 }
 0x2cd   : > { %vm525_vm6 = vcmp.gt.f32.partialorder %v524_v2, 0.0  ;;  %v530_v3 = vmul.f32 %v528_v1, %v524_v2 }
 0x2cf   : > { %v531_v4 = vsel %vm525_vm6, %v524_v2, %v530_v3 }
 0x2d0   : > { %v532_v5 = vmul.f32 %v663_v28, %v531_v4 }
 0x2d2   : > { %533 = vst [vmem:[#allocation2] sm:$0xff] %v532_v5  ;;  %538 = vst [vmem:[%s211_s22] sm:$0xff] (!%p665_p1), %v532_v5 }
 0x2d3 PF: > { %s667_s5 = sshll.u32 %s890_s16, 7  ;;  %s553_s9 = sshll.u32 %s211_s22, 4  ;;  %s554_s9 = int_to_ptr.vmem [resolvable:$true] %s553_s9 }
 0x2d4   : > { %s1048_s8 = scalar_lea.hbm %s1102_s3, %s667_s5  ;;  %s1109_s10 = sand.u32 1, %s878_s13  }
 0x2d5   : > { %s540_s15 = scalar_lea.sflag [#allocation4], %s1109_s10  ;;  %s808_s11 = scalar_lea.vmem %s554_s9, 128 }
 0x2d6   : > { %p809_p2 = scmp.ne.s32.totalorder %s554_s9, %s808_s11  ;;  %s914_s20 = smov [#allocation3]  }
 0x2d7   : > { %s812_s21 = sshll.u32 %s914_s20, 4  ;;  %s813_s21 = int_to_ptr.vmem [resolvable:$false] %s812_s21 }
 0x2d8   : > { %p810_p4 = pnand %p809_p2, %p984_p3  ;;  %s814_s26 = scalar_lea.vmem %s813_s21, 256 }
 0x2d9   : > { %p815_p6 = scmp.lt.s32.totalorder %s554_s9, %s813_s21  ;;  %p816_p7 = scmp.lt.s32.totalorder %s814_s26, %s808_s11 }
 0x2da   : > { %p811_p5 = pneg %p810_p4 }
 0x2db   : > { %p817_p8 = por %p816_p7, %p815_p6 }
 0x2dd   : > { %p818_p10 = pnand %p817_p8, %p811_p5 }
 0x2df   : > { %821 = shalt.err (!%p818_p10)
}
 0x2e0   : > { %s822_s16 = scalar_lea.hbm %s1048_s8, 128  ;;  %s826_s27 = scalar_lea.hbm %s1102_s3, 256 }
 0x2e1   : > { %p823_p11 = scmp.ne.s32.totalorder %s1048_s8, %s822_s16  ;;  %p827_p0 = scmp.lt.u32.totalorder %s1048_s8, %s1102_s3 }
 0x2e2   : > { %p828_p1 = scmp.lt.u32.totalorder %s826_s27, %s822_s16  ;;  %p830_p4 = scmp.lt.u32.totalorder %s822_s16, %s1048_s8 }
 0x2e3   : > { %p824_p12 = pnand %p823_p11, %p984_p3 }
 0x2e4   : > { %p829_p2 = por %p828_p1, %p827_p0 }
 0x2e5   : > { %p825_p13 = pneg %p824_p12 }
 0x2e6   : > { %p831_p5 = por %p830_p4, %p829_p2 }
 0x2e8   : > { %p832_p6 = pnand %p831_p5, %p825_p13 }
 0x2ea   : > { %835 = shalt.err (!%p832_p6)
}
 0x2eb   : > { %710 = dma.vmem_to_hbm [thread:$0]  (%p984_p3), %s554_s9, 128, %s1048_s8, %s540_s15  }
 0x2ec PF: > { %p716_p7 = scmp.ge.s32.totalorder %s902_s19, 2  ;;  %s565_s29 = sand.u32 1, %s874_s12  }
 0x2ed   : > { %s566_s5 = scalar_lea.sflag [#allocation4], %s565_s29 }
 0x2ee   : > { %p713_p8 = pnand %p716_p7, %p994_p9 }
 0x2f0   : > { %869 = dma.done.wait (!%p713_p8), %s566_s5, 128  }
 0x2f1   : > { %871 = vsyncadd (!%p713_p8), %s566_s5, 4294967168  ;;  %s16_s19 = sadd.s32 1, %s902_s19   ;;  %s1110_s24 = sld [smem:[#allocation6_spill]] }
 0x2f2   : > { %p13_p10 = scmp.ge.s32.totalorder %s16_s19, 10   ;;  %s1111_s6 = sld [smem:[#allocation7_spill]] }
 0x2f3   : > { %s1112_s12 = smov %s878_s13  ;;  %s1113_s13 = smov %s882_s14 }
 0x2f4   : > { %s1114_s14 = smov %s1002_s28  ;;  %s1115_s15 = smov %s894_s17 }
 0x2f5   : > { %s1116_s16 = smov %s898_s18  ;;  %15 = sbr.rel (!%p13_p10) target bundleno = 5 (0x5), region = 81 }
 0x2f7   : > { %s1117_s17 = smov %s1110_s24 }
 0x2f8   : > { %s1118_s18 = smov %s1111_s6 }
 0x2fc   :  { %571 = vsyncpa [#allocation4], 1 }
 0x2fd   :  { %573 = vsyncpa [#allocation4 + $0x1], 1 }

</bundles_post_ra>
